<compile_context>
chip_gen: v5e
topology: v5e:2x2
jax: 0.10.0
libtpu: 0.0.40
codegen_flags: <defaults>
</compile_context>

<pallas_src>
import functools

import jax
import jax.numpy as jnp
from jax.experimental import pallas as pl
from jax.experimental.pallas import tpu as pltpu


def _cdiv(a, b):
    return -(-a // b)


def _floor_mult(x, m):
    return (x // m) * m


def _ceil_mult(x, m):
    return _cdiv(x, m) * m


def _vmem_capacity_bytes():
    try:
        return int(pltpu.get_tpu_info().vmem_capacity_bytes)
    except Exception:
        return 64 << 20  # conservative fallback (v7x physical VMEM per core)


def _pick_tiles(nc, hw, itemsize, per_buf_bytes):
    """Pick (row_tile R, lane_tile THW) against a per-buffer VMEM budget.

    R is a multiple of the sublane packing (or the full row count);
    THW is a multiple of 128 (or the full HW extent, exact => no masking).
    """
    sub = {4: 8, 2: 16, 1: 32}.get(itemsize, 8)
    target_elems = max(sub * 128, per_buf_bytes // itemsize)

    if hw <= 128 or hw * sub * itemsize <= per_buf_bytes:
        thw = hw                                    # full row width: exact
    else:
        lane_cap = max(128, _floor_mult(per_buf_bytes // (sub * itemsize), 128))
        n_lane_tiles = _cdiv(hw, lane_cap)
        # spread HW over the tiles to minimize masked tail waste
        thw = min(lane_cap, _ceil_mult(_cdiv(hw, n_lane_tiles), 128))

    row_cap = max(sub, target_elems // thw)
    # keep a few row blocks when rows are plentiful so the DMA pipeline
    # always has something to overlap with
    if nc > 4 * sub:
        row_cap = min(row_cap, _ceil_mult(_cdiv(nc, 4), sub))
    if nc <= row_cap:
        r = nc                                      # full-dim exception
    else:
        r = _floor_mult(row_cap, sub)
    return r, thw


def _reduce_kernel(x_ref, sum_ref, sq_ref, *, hw, thw, t_split, needs_mask):
    """Per-row (per (n, c)) sum / sum-of-squares over the hw-tile grid axis."""
    @pl.when(pl.program_id(2) == 0)
    def _():
        sum_ref[...] = jnp.zeros_like(sum_ref)
        sq_ref[...] = jnp.zeros_like(sq_ref)

    xf = x_ref[...].astype(jnp.float32)                      # (R, thw)
    if needs_mask:
        # zero the padded lane tail of the final tile so it doesn't pollute
        # the statistics (Pallas pads out-of-bounds reads with garbage)
        start = (pl.program_id(1) * t_split + pl.program_id(2)) * thw
        lane = jax.lax.broadcasted_iota(jnp.int32, xf.shape, 1)
        xf = jnp.where(start + lane < hw, xf, 0.0)

    sum_ref[...] += jnp.sum(xf, axis=-1, keepdims=True)[None]   # (1, R, 1)
    sq_ref[...] += jnp.sum(xf * xf, axis=-1, keepdims=True)[None]


def _normalize_kernel(x_ref, scale_ref, shift_ref, o_ref):
    """y = x * scale + shift  (inv-std + affine folded into scale/shift)."""
    xf = x_ref[...].astype(jnp.float32)                      # (R, thw)
    o_ref[...] = (xf * scale_ref[...] + shift_ref[...]).astype(o_ref.dtype)


def batch_norm_2d_f(x_nchw, weight, bias, kl, *, eps=1e-5, _per_buffer_bytes=None):
    """Forward of _BatchNormBayesian's F.batch_norm (training mode) on NCHW.

    x_nchw : (N, C, H, W) activations
    weight : (C,) sampled affine gamma
    bias   : (C,) sampled affine beta
    kl     : scalar, passed through unchanged
    """
    N, C, H, W = x_nchw.shape
    HW = H * W
    NC = N * C
    M = N * HW
    dtype = x_nchw.dtype
    itemsize = jnp.dtype(dtype).itemsize

    x2d = x_nchw.reshape(NC, HW)                   # free view of contiguous NCHW

    vmem_cap = _vmem_capacity_bytes()
    per_buf = _per_buffer_bytes
    if per_buf is None:
        per_buf = max(1 << 20, min(4 << 20, vmem_cap // 16))
    R, thw = _pick_tiles(NC, HW, itemsize, per_buf)
    tile_bytes = R * thw * itemsize
    # pass 2 holds 4 double-buffered big buffers (+ possible f32 temps);
    # budget explicitly and hand the compiler a matching limit.
    vmem_limit = int(max(16 << 20,
                         min(vmem_cap - (8 << 20), 8 * tile_bytes + (8 << 20))))

    G_r = _cdiv(NC, R)
    T_total = _cdiv(HW, thw)
    # Megacore (v7x) insurance: when the row axis gives no parallelism, split
    # the hw-tile axis into two "parallel" halves with separate partials
    # (only when it splits evenly, so no block index ever goes out of range).
    S = 2 if (G_r == 1 and T_total >= 2 and T_total % 2 == 0) else 1
    T_s = T_total // S
    needs_mask = (HW % thw) != 0

    reduce_kernel = functools.partial(
        _reduce_kernel, hw=HW, thw=thw, t_split=T_s, needs_mask=needs_mask)

    # ---- pass 1: streamed per-row sum / sumsq reduction --------------------
    sums, sqs = pl.pallas_call(
        reduce_kernel,
        out_shape=(jax.ShapeDtypeStruct((S, NC, 1), jnp.float32),
                   jax.ShapeDtypeStruct((S, NC, 1), jnp.float32)),
        grid=(G_r, S, T_s),
        in_specs=[pl.BlockSpec((R, thw), lambda r, s, t: (r, s * T_s + t))],
        out_specs=(pl.BlockSpec((1, R, 1), lambda r, s, t: (s, r, 0)),
                   pl.BlockSpec((1, R, 1), lambda r, s, t: (s, r, 0))),
        compiler_params=pltpu.CompilerParams(
            dimension_semantics=("parallel", "parallel", "arbitrary"),
            vmem_limit_bytes=vmem_limit),
    )(x2d)

    # ---- tiny C-sized finalize in plain JAX: fold affine --------------------
    tot = jnp.sum(sums, axis=0).reshape(N, C).sum(axis=0)        # (C,)
    tot_sq = jnp.sum(sqs, axis=0).reshape(N, C).sum(axis=0)      # (C,)
    mean = tot / M
    var = jnp.maximum(tot_sq / M - mean * mean, 0.0)   # biased batch variance
    inv_std = jax.lax.rsqrt(var + eps)
    scale_c = weight.astype(jnp.float32) * inv_std               # (C,)
    shift_c = bias.astype(jnp.float32) - mean * scale_c          # (C,)
    scale_rows = jnp.tile(scale_c, N).reshape(NC, 1)             # per (n, c) row
    shift_rows = jnp.tile(shift_c, N).reshape(NC, 1)

    # ---- pass 2: streamed normalize, fully parallel grid --------------------
    y2d = pl.pallas_call(
        _normalize_kernel,
        out_shape=jax.ShapeDtypeStruct((NC, HW), dtype),
        grid=(G_r, T_total),
        in_specs=[pl.BlockSpec((R, thw), lambda r, t: (r, t)),
                  pl.BlockSpec((R, 1), lambda r, t: (r, 0)),
                  pl.BlockSpec((R, 1), lambda r, t: (r, 0))],
        out_specs=pl.BlockSpec((R, thw), lambda r, t: (r, t)),
        compiler_params=pltpu.CompilerParams(
            dimension_semantics=("parallel", "parallel"),
            vmem_limit_bytes=vmem_limit),
    )(x2d, scale_rows, shift_rows)

    return y2d.reshape(N, C, H, W), kl


if __name__ == "__main__":
    key = jax.random.PRNGKey(0)
    k_x, k_w, k_b = jax.random.split(key, 3)

    N, C, H, W = 2, 4, 16, 16
    x = jax.random.normal(k_x, (N, C, H, W), dtype=jnp.float32)

    # Affine params as sampled by the Bayesian module; non-trivial values to
    # exercise the scale/shift folding.
    weight = jax.random.uniform(k_w, (C,), dtype=jnp.float32)
    bias = 0.1 * jax.random.normal(k_b, (C,), dtype=jnp.float32)
    kl = jnp.float32(0.0)

    def ref_bn(xr, w, b, eps):
        m = jnp.mean(xr, axis=(0, 2, 3), keepdims=True)
        v = jnp.mean((xr - m) ** 2, axis=(0, 2, 3), keepdims=True)
        return (xr - m) / jnp.sqrt(v + eps) * w.reshape(1, -1, 1, 1) \
            + b.reshape(1, -1, 1, 1)

    y, kl_out = batch_norm_2d_f(x, weight, bias, kl, eps=1e-5)
    jax.block_until_ready(y)
    jax.block_until_ready(kl_out)
    err = float(jnp.max(jnp.abs(y - ref_bn(x, weight, bias, 1e-5))))
    assert err < 1e-4, f"mismatch vs reference: {err}"
    assert float(jnp.abs(kl_out - kl)) == 0.0

    # Exercise the lane-tiled / masked-tail / split-reduce path by forcing a
    # tiny per-buffer budget (HW=144 -> two 128-lane tiles, second masked).
    x2 = jax.random.normal(jax.random.PRNGKey(1), (1, C, 12, 12),
                           dtype=jnp.float32)
    y2, _ = batch_norm_2d_f(x2, weight, bias, kl, eps=1e-5,
                            _per_buffer_bytes=4096)
    jax.block_until_ready(y2)
    err2 = float(jnp.max(jnp.abs(y2 - ref_bn(x2, weight, bias, 1e-5))))
    assert err2 < 1e-4, f"tiled-path mismatch vs reference: {err2}"

    print("KERNEL_OK")
</pallas_src>

<mosaic_0001>
module attributes {stable_mosaic.version = 11 : i64} {
  func.func @_reduce_kernel(%arg0: i32, %arg1: i32, %arg2: i32, %arg3: memref<8x256xf32, #tpu.memory_space<vmem>>, %arg4: memref<1x8x1xf32, #tpu.memory_space<vmem>>, %arg5: memref<1x8x1xf32, #tpu.memory_space<vmem>>) attributes {dimension_semantics = [#tpu.dimension_semantics<parallel>, #tpu.dimension_semantics<parallel>, #tpu.dimension_semantics<arbitrary>], iteration_bounds = array<i64: 1, 1, 1>, scalar_prefetch = 0 : i64, scratch_operands = 0 : i64, tpu.core_type = #tpu.core_type<tc>, window_params = [{transform_indices = @transform_0, window_bounds = array<i64: 8, 256>}, {transform_indices = @transform_1, window_bounds = array<i64: 1, 8, 1>}, {transform_indices = @transform_2, window_bounds = array<i64: 1, 8, 1>}]} {
    %c0_i32 = arith.constant 0 : i32
    %0 = arith.cmpi eq, %arg2, %c0_i32 : i32
    %1 = arith.extui %0 : i1 to i32
    %c0_i32_0 = arith.constant 0 : i32
    %2 = arith.cmpi ne, %1, %c0_i32_0 : i32
    scf.if %2 {
      %cst_15 = arith.constant 0.000000e+00 : f32
      %17 = vector.broadcast %cst_15 : f32 to vector<1x8x1xf32>
      %c0_16 = arith.constant 0 : index
      %c0_17 = arith.constant 0 : index
      %c0_18 = arith.constant 0 : index
      %18 = vector.load %arg4[%c0_16, %c0_17, %c0_18] : memref<1x8x1xf32, #tpu.memory_space<vmem>>, vector<1x8x1xf32>
      tpu.vector_store %arg4[%c0_16, %c0_17, %c0_18], %17 {strides = array<i32>} : memref<1x8x1xf32, #tpu.memory_space<vmem>>, vector<1x8x1xf32>,
      %cst_19 = arith.constant 0.000000e+00 : f32
      %19 = vector.broadcast %cst_19 : f32 to vector<1x8x1xf32>
      %c0_20 = arith.constant 0 : index
      %c0_21 = arith.constant 0 : index
      %c0_22 = arith.constant 0 : index
      %20 = vector.load %arg5[%c0_20, %c0_21, %c0_22] : memref<1x8x1xf32, #tpu.memory_space<vmem>>, vector<1x8x1xf32>
      tpu.vector_store %arg5[%c0_20, %c0_21, %c0_22], %19 {strides = array<i32>} : memref<1x8x1xf32, #tpu.memory_space<vmem>>, vector<1x8x1xf32>,
    } else {
    }
    %c0 = arith.constant 0 : index
    %c0_1 = arith.constant 0 : index
    %3 = vector.load %arg3[%c0, %c0_1] : memref<8x256xf32, #tpu.memory_space<vmem>>, vector<8x256xf32>
    %c0_2 = arith.constant 0 : index
    %c0_3 = arith.constant 0 : index
    %c0_4 = arith.constant 0 : index
    %4 = vector.load %arg4[%c0_2, %c0_3, %c0_4] : memref<1x8x1xf32, #tpu.memory_space<vmem>>, vector<1x8x1xf32>
    %cst = arith.constant dense<0.000000e+00> : vector<8xf32>
    %5 = vector.multi_reduction <add>, %3, %cst [1] : vector<8x256xf32> to vector<8xf32>
    %6 = vector.shape_cast %5 : vector<8xf32> to vector<8x1xf32>
    %7 = vector.shape_cast %6 : vector<8x1xf32> to vector<1x8x1xf32>
    %8 = arith.addf %4, %7 : vector<1x8x1xf32>
    %c0_5 = arith.constant 0 : index
    %c0_6 = arith.constant 0 : index
    %c0_7 = arith.constant 0 : index
    %9 = vector.load %arg4[%c0_5, %c0_6, %c0_7] : memref<1x8x1xf32, #tpu.memory_space<vmem>>, vector<1x8x1xf32>
    tpu.vector_store %arg4[%c0_5, %c0_6, %c0_7], %8 {strides = array<i32>} : memref<1x8x1xf32, #tpu.memory_space<vmem>>, vector<1x8x1xf32>,
    %c0_8 = arith.constant 0 : index
    %c0_9 = arith.constant 0 : index
    %c0_10 = arith.constant 0 : index
    %10 = vector.load %arg5[%c0_8, %c0_9, %c0_10] : memref<1x8x1xf32, #tpu.memory_space<vmem>>, vector<1x8x1xf32>
    %11 = arith.mulf %3, %3 : vector<8x256xf32>
    %cst_11 = arith.constant dense<0.000000e+00> : vector<8xf32>
    %12 = vector.multi_reduction <add>, %11, %cst_11 [1] : vector<8x256xf32> to vector<8xf32>
    %13 = vector.shape_cast %12 : vector<8xf32> to vector<8x1xf32>
    %14 = vector.shape_cast %13 : vector<8x1xf32> to vector<1x8x1xf32>
    %15 = arith.addf %10, %14 : vector<1x8x1xf32>
    %c0_12 = arith.constant 0 : index
    %c0_13 = arith.constant 0 : index
    %c0_14 = arith.constant 0 : index
    %16 = vector.load %arg5[%c0_12, %c0_13, %c0_14] : memref<1x8x1xf32, #tpu.memory_space<vmem>>, vector<1x8x1xf32>
    tpu.vector_store %arg5[%c0_12, %c0_13, %c0_14], %15 {strides = array<i32>} : memref<1x8x1xf32, #tpu.memory_space<vmem>>, vector<1x8x1xf32>,
    return
  }
  func.func @transform_0(%arg0: i32, %arg1: i32, %arg2: i32) -> (i32, i32) {
    %c1_i32 = arith.constant 1 : i32
    %0 = arith.muli %arg1, %c1_i32 : i32
    %1 = arith.addi %0, %arg2 : i32
    %c0_i32 = arith.constant 0 : i32
    return %arg0, %1 : i32, i32
  }
  func.func @transform_1(%arg0: i32, %arg1: i32, %arg2: i32) -> (i32, i32, i32) {
    %c0_i32 = arith.constant 0 : i32
    %c0_i32_0 = arith.constant 0 : i32
    return %arg1, %arg0, %c0_i32 : i32, i32, i32
  }
  func.func @transform_2(%arg0: i32, %arg1: i32, %arg2: i32) -> (i32, i32, i32) {
    %c0_i32 = arith.constant 0 : i32
    %c0_i32_0 = arith.constant 0 : i32
    return %arg1, %arg0, %c0_i32 : i32, i32, i32
  }
}

</mosaic_0001>

<bundles_post_ra>
// kernel: tpu_custom_call.1
= control target key start
LH: loop header
LB: loop body
LE: loop exit
PB: predicated region body
PF: predicated region fallthrough
CT: control target
= control target key end

     0   :  { %8 = vsyncpa [#allocation3], 0  ;;  %s91_s12 = smov [#allocation2]   ;;  %s133_s0 = inlined_call_operand.hbm [shape: f32[8,256], index: 0, kind: input, shape index: {}]   ;;  %s134_s1 = inlined_call_operand.vmem [shape: f32[1,8,1], index: 1, kind: output, shape index: {0}]   ;;  %s135_s2 = inlined_call_operand.vmem [shape: f32[1,8,1], index: 2, kind: output, shape index: {1}]  }
   0x1   :  { %s18_s11 = sshll.u32 %s133_s0, 4  ;;  %s20_s13 = sshll.u32 %s91_s12, 4  ;;  %s19_s11 = int_to_ptr.hbm [resolvable:$true] %s18_s11  ;;  %s21_s13 = int_to_ptr.vmem [resolvable:$true] %s20_s13 }
   0x2   :  { %23 = dma.hbm_to_vmem [thread:$0]  %s19_s11, 256, %s21_s13, [#allocation3]  }
   0x3   :  { %89 = dma.done.wait [#allocation3], 256  }
   0x4   :  { %90 = vsyncadd [#allocation3], 4294967040  ;;  %vm34_vm0 = vcmask 7168   ;;  %v92_v0 = vmov 0.0   ;;  %v37_v1 = vld [vmem:[#allocation2] sm:$0xff]  ;;  %v38_v2 = vld [vmem:[#allocation2 + $0x8] sm:$0xff] }
   0x5   :  { %35 = vst.msk [vmem:[%s134_s1] sm:$0xff] %vm34_vm0, %v92_v0  ;;  %v40_v3 = vadd.f32 %v38_v2, %v37_v1  ;;  %v47_v4 = vmul.f32 %v37_v1, %v37_v1  ;;  %v48_v5 = vmul.f32 %v38_v2, %v38_v2 }
   0x6   :  { %36 = vst.msk [vmem:[%s135_s2] sm:$0xff] %vm34_vm0, %v92_v0 }
   0x7   :  { %41 = vadd.xlane.f32.xlu0 %v40_v3  ;;  %v49_v6 = vadd.f32 %v48_v5, %v47_v4 }
   0xc   :  { %v39_v7 = vld [vmem:[%s134_s1] sm:$0xff] }
   0xd   :  { %v46_v10 = vld [vmem:[%s135_s2] sm:$0xff] }
   0xf   :  { %50 = vadd.xlane.f32.xlu0 %v49_v6 }
  0x7a   :  { %v42_v8 = vpop.xlane.xlu0 %41 }
  0x7b   :  { %v43_v9 = vadd.f32 %v42_v8, %v39_v7 }
  0x7d   :  { %45 = vst.msk [vmem:[%s134_s1] sm:$0xff] %vm34_vm0, %v43_v9 }
  0x82   :  { %v51_v11 = vpop.xlane.xlu0 %50 }
  0x83   :  { %v52_v12 = vadd.f32 %v51_v11, %v46_v10 }
  0x85   :  { %53 = vst.msk [vmem:[%s135_s2] sm:$0xff] %vm34_vm0, %v52_v12 }
  0x86   :  { %62 = vsyncpa [#allocation3], 1 }

</bundles_post_ra>
